<compile_context>
chip_gen: v7x
topology: tpu7x:2x2x1
jax: 0.10.0
libtpu: 0.0.40
codegen_flags: <defaults>
</compile_context>

<pallas_src>
import functools

import jax
import jax.numpy as jnp
from jax import lax
from jax.experimental import pallas as pl
from jax.experimental.pallas import tpu as pltpu

_LANES = 128
_SUBLANES = 8
_TILE_BYTES = 8 * 1024 * 1024    # per-step input-tile budget (8 MiB)
_VMEM_LIMIT = 40 * 1024 * 1024   # scoped-VMEM request; safe on v5e/v6e/v7x
_CHUNK_ROWS = 128                # rows folded per fori_loop step (16 f32 vregs)
_MAX_BATCH_TILE = 4096           # caps the (b_tile, 128) f32 output block at 2 MiB


# --------------------------------------------------------------------------
# Path A: C*H*W fits a single VMEM tile -> batch-tiled, whole feature / step.
# --------------------------------------------------------------------------
def _relu_rowsum_kernel(x_ref, o_ref):
    # x_ref: (b_tile, F) input block; o_ref: (b_tile, 128) f32 output block.
    x = x_ref[...]
    r = jnp.maximum(x, 0).astype(jnp.float32)
    totals = jnp.sum(r, axis=-1, keepdims=True)           # (b_tile, 1)
    o_ref[...] = jnp.broadcast_to(totals, o_ref.shape)    # lane-dense store


def _forward_small(x2d, n, feat, row_cap):
    if n <= row_cap:
        b_tile = n                                         # whole batch, 1 step
    else:
        b_tile = max(_SUBLANES, (row_cap // _SUBLANES) * _SUBLANES)
    num_b = pl.cdiv(n, b_tile)   # ragged last batch block: OOB rows are
    #                              row-independent garbage; OOB writes dropped.

    out = pl.pallas_call(
        _relu_rowsum_kernel,
        out_shape=jax.ShapeDtypeStruct((n, _LANES), jnp.float32),
        grid_spec=pltpu.PrefetchScalarGridSpec(
            num_scalar_prefetch=0,
            grid=(num_b,),
            in_specs=[pl.BlockSpec((b_tile, feat), lambda b: (b, 0))],
            out_specs=pl.BlockSpec((b_tile, _LANES), lambda b: (b, 0)),
        ),
        compiler_params=pltpu.CompilerParams(
            dimension_semantics=("parallel",),
            vmem_limit_bytes=_VMEM_LIMIT,
        ),
    )(x2d)
    return out[:, 0]


# --------------------------------------------------------------------------
# Path B: large C*H*W -> per-batch-row reduction over 8 MiB (rows, 128) tiles.
# --------------------------------------------------------------------------
def _relu_reduce_kernel(x_ref, o_ref, acc_ref, *, tile_rows, chunk, num_chunks,
                        num_half, rows, needs_mask):
    # x_ref:   (1, tile_rows, 128) input tile
    # o_ref:   (1, 1, 8, 128) f32 output slab for this (split, batch) pair
    # acc_ref: (8, 128) f32 accumulator, persistent across the reduction axis
    s = pl.program_id(0)
    f = pl.program_id(2)

    @pl.when(f == 0)
    def _init():
        acc_ref[...] = jnp.zeros_like(acc_ref)

    row0 = (s * num_half + f) * tile_rows

    def body(i, carry):
        base = pl.multiple_of(i * chunk, chunk)
        blk = x_ref[0, pl.ds(base, chunk), :]              # (chunk, 128)
        r = jnp.maximum(blk, 0).astype(jnp.float32)
        if needs_mask:                                     # static: ragged tiles only
            rid = row0 + base + lax.broadcasted_iota(jnp.int32, (chunk, _LANES), 0)
            r = jnp.where(rid < rows, r, 0.0)
        # Fold chunk rows into the 8-sublane accumulator: pure VPU adds.
        acc_ref[...] += r.reshape(chunk // _SUBLANES, _SUBLANES, _LANES).sum(axis=0)
        return carry

    lax.fori_loop(0, num_chunks, body, 0, unroll=min(4, num_chunks))

    @pl.when(f == num_half - 1)
    def _finalize():
        total = jnp.sum(acc_ref[...])                      # one XLU reduce / row
        o_ref[...] = jnp.full(o_ref.shape, total, jnp.float32)


def _forward_reduce(x2d, n, feat, itemsize, max_tile_bytes):
    # Pad only to the 8x128=1024-element boundary required by the (rows, 128)
    # view; padded entries are zero and relu(0)=0, so sums are unaffected.
    pad_to = _SUBLANES * _LANES
    feat_pad = pl.cdiv(feat, pad_to) * pad_to
    if feat_pad != feat:
        # TODO(synk): this one jnp.pad copy only triggers when C*H*W is not a
        # multiple of 1024; a fully pad-free path would need a ragged-tail kernel.
        x2d = jnp.pad(x2d, ((0, 0), (0, feat_pad - feat)))
    rows = feat_pad // _LANES                              # multiple of 8
    x3d = x2d.reshape(n, rows, _LANES)                     # free reshape

    max_tile_rows = max(_SUBLANES,
                        (max_tile_bytes // (_LANES * itemsize)) // _SUBLANES * _SUBLANES)
    tile_rows = min(max_tile_rows, rows)                   # multiple of 8
    num_f = pl.cdiv(rows, tile_rows)

    # v7x has 2 TensorCores: for batch==1 split the reduction range across a
    # leading parallel axis so both cores stream half the rows.
    n_split = 2 if (n == 1 and num_f >= 2) else 1
    num_half = pl.cdiv(num_f, n_split)
    needs_mask = (n_split * num_half * tile_rows) != rows

    chunk = next(c for c in (_CHUNK_ROWS, 64, 32, 16, 8) if tile_rows % c == 0)
    num_chunks = tile_rows // chunk

    kernel = functools.partial(
        _relu_reduce_kernel, tile_rows=tile_rows, chunk=chunk,
        num_chunks=num_chunks, num_half=num_half, rows=rows,
        needs_mask=needs_mask)

    out = pl.pallas_call(
        kernel,
        out_shape=jax.ShapeDtypeStruct((n_split, n, _SUBLANES, _LANES), jnp.float32),
        grid_spec=pltpu.PrefetchScalarGridSpec(
            num_scalar_prefetch=0,
            grid=(n_split, n, num_half),
            in_specs=[pl.BlockSpec(
                (1, tile_rows, _LANES),
                # clamp so the over-extended half of a split never indexes past
                # the last row block; masked rows contribute zero anyway.
                lambda s, b, f: (b, jnp.minimum(s * num_half + f, num_f - 1), 0),
            )],
            out_specs=pl.BlockSpec(
                (1, 1, _SUBLANES, _LANES), lambda s, b, f: (s, b, 0, 0)),
            scratch_shapes=[pltpu.VMEM((_SUBLANES, _LANES), jnp.float32)],
        ),
        compiler_params=pltpu.CompilerParams(
            dimension_semantics=("parallel", "parallel", "arbitrary"),
            vmem_limit_bytes=_VMEM_LIMIT,
        ),
    )(x3d)
    return jnp.sum(out[:, :, 0, 0], axis=0)                # (n,) f32


# --------------------------------------------------------------------------
# Wrapper / dispatcher
# --------------------------------------------------------------------------
def toy_model_forward(x: jax.Array, *, max_tile_bytes: int = _TILE_BYTES) -> jax.Array:
    """Pallas equivalent of ToyModel.forward: sum(relu(x), dim=(1, 2, 3))."""
    n, c, h, w = x.shape
    feat = c * h * w
    itemsize = jnp.dtype(x.dtype).itemsize
    x2d = x.reshape(n, feat)

    bytes_per_row = feat * itemsize
    row_cap = max(1, min(max_tile_bytes // max(bytes_per_row, 1), _MAX_BATCH_TILE))
    use_small = (bytes_per_row <= max_tile_bytes
                 and (n <= row_cap or row_cap >= _SUBLANES))

    if use_small:
        out = _forward_small(x2d, n, feat, row_cap)
    else:
        out = _forward_reduce(x2d, n, feat, itemsize, max_tile_bytes)
    return out.astype(x.dtype)


if __name__ == "__main__":
    key = jax.random.PRNGKey(0)

    # Primary check: small NCHW input consistent with the module's forward.
    x = jax.random.normal(key, (2, 4, 16, 16), dtype=jnp.float32)
    y = toy_model_forward(x)
    jax.block_until_ready(y)
    y_ref = jnp.sum(jnp.maximum(x, 0.0), axis=(1, 2, 3))
    assert y.shape == (2,), f"bad output shape {y.shape}"
    assert jnp.allclose(y, y_ref, rtol=1e-5, atol=1e-5), "mismatch vs reference"

    # Secondary checks: force the large-feature reduction path (ragged row
    # tiles, lane padding, and the batch==1 two-way split) with a tiny tile
    # budget so it stays fast at small shapes.
    for shape in ((3, 4, 33, 16), (1, 4, 33, 16)):
        xb = jax.random.normal(jax.random.PRNGKey(1), shape, dtype=jnp.float32)
        yb = toy_model_forward(xb, max_tile_bytes=8192)
        jax.block_until_ready(yb)
        yb_ref = jnp.sum(jnp.maximum(xb, 0.0), axis=(1, 2, 3))
        assert yb.shape == (shape[0],), f"bad output shape {yb.shape}"
        assert jnp.allclose(yb, yb_ref, rtol=1e-5, atol=1e-5), f"mismatch {shape}"

    print("KERNEL_OK")
</pallas_src>

<mosaic_0001>
module attributes {stable_mosaic.version = 11 : i64} {
  func.func @_relu_rowsum_kernel(%arg0: i32, %arg1: memref<2x1024xf32, #tpu.memory_space<vmem>>, %arg2: memref<2x128xf32, #tpu.memory_space<vmem>>) attributes {dimension_semantics = [#tpu.dimension_semantics<parallel>], iteration_bounds = array<i64: 1>, scalar_prefetch = 0 : i64, scratch_operands = 0 : i64, tpu.core_type = #tpu.core_type<tc>, window_params = [{transform_indices = @transform_0, window_bounds = array<i64: 2, 1024>}, {transform_indices = @transform_1, window_bounds = array<i64: 2, 128>}]} {
    %c0 = arith.constant 0 : index
    %c0_0 = arith.constant 0 : index
    %0 = vector.load %arg1[%c0, %c0_0] : memref<2x1024xf32, #tpu.memory_space<vmem>>, vector<2x1024xf32>
    %cst = arith.constant 0.000000e+00 : f32
    %1 = vector.broadcast %cst : f32 to vector<2x1024xf32>
    %2 = arith.maximumf %0, %1 : vector<2x1024xf32>
    %cst_1 = arith.constant dense<0.000000e+00> : vector<2xf32>
    %3 = vector.multi_reduction <add>, %2, %cst_1 [1] : vector<2x1024xf32> to vector<2xf32>
    %4 = vector.shape_cast %3 : vector<2xf32> to vector<2x1xf32>
    %5 = vector.shape_cast %4 : vector<2x1xf32> to vector<2x1xf32>
    %6 = vector.broadcast %5 : vector<2x1xf32> to vector<2x128xf32>
    %c0_2 = arith.constant 0 : index
    %c0_3 = arith.constant 0 : index
    %7 = vector.load %arg2[%c0_2, %c0_3] : memref<2x128xf32, #tpu.memory_space<vmem>>, vector<2x128xf32>
    tpu.vector_store %arg2[%c0_2, %c0_3], %6 {strides = array<i32>} : memref<2x128xf32, #tpu.memory_space<vmem>>, vector<2x128xf32>,
    return
  }
  func.func @transform_0(%arg0: i32) -> (i32, i32) {
    %c0_i32 = arith.constant 0 : i32
    %c0_i32_0 = arith.constant 0 : i32
    return %arg0, %c0_i32 : i32, i32
  }
  func.func @transform_1(%arg0: i32) -> (i32, i32) {
    %c0_i32 = arith.constant 0 : i32
    %c0_i32_0 = arith.constant 0 : i32
    return %arg0, %c0_i32 : i32, i32
  }
}

</mosaic_0001>

<bundles_post_ra>
// kernel: tpu_custom_call.1
= control target key start
LH: loop header
LB: loop body
LE: loop exit
PB: predicated region body
PF: predicated region fallthrough
CT: control target
= control target key end

     0   :  { %6 = vsyncpa [#allocation3], 0  ;;  %s199_s0 = inlined_call_operand.hbm [shape: f32[2,1024], index: 0, kind: input, shape index: {}]   ;;  %s200_s1 = inlined_call_operand.hbm [shape: f32[2,128], index: 1, kind: output, shape index: {}]  }
   0x1   :  { %7 = vsyncpa [#allocation4], 0  ;;  %s154_s6 = smov [#allocation2]   ;;  %s106_s10 = scalar_lea.hbm %s199_s0, 256 }
   0x2   :  { %s14_s7 = sshll.u32 %s154_s6, 4  ;;  %p107_p0 = scmp.ne.s32.totalorder %s199_s0, %s106_s10  ;;  %s15_s7 = int_to_ptr.vmem [resolvable:$true] %s14_s7 }
   0x3   :  { %p110_p1 = scmp.lt.u32.totalorder %s106_s10, %s199_s0 }
   0x5   :  { %p112_p2 = pnand %p110_p1, %p107_p0 }
   0x7   :  { %115 = shalt.err (!%p112_p2)
}
   0x8   :  { %s116_s15 = scalar_lea.vmem %s15_s7, 256  ;;  %p121_p4 = scmp.lt.s32.totalorder %s15_s7, %s15_s7 }
   0x9   :  { %p117_p3 = scmp.ne.s32.totalorder %s15_s7, %s116_s15  ;;  %p122_p5 = scmp.lt.s32.totalorder %s116_s15, %s116_s15 }
   0xb   :  { %p123_p6 = por %p122_p5, %p121_p4 }
   0xd   :  { %p124_p7 = pnand %p123_p6, %p117_p3 }
   0xf   :  { %127 = shalt.err (!%p124_p7)
}
  0x10   :  { %17 = dma.hbm_to_vmem [thread:$0]  %s199_s0, 256, %s15_s7, [#allocation3]  }
  0x11   :  { %150 = dma.done.wait [#allocation3], 256  }
  0x12   :  { %151 = vsyncadd [#allocation3], 4294967040  ;;  %v31_v0 = vlaneseq  ;;  %v155_v1 = vmov 1983009808   ;;  %v21_v6 = vld [vmem:[#allocation2] sm:$0xff]  ;;  %v22_v7 = vld [vmem:[#allocation2 + $0x8] sm:$0xff] }
  0x13   :  { %v29_v2 = vunpack.c.l.s4 %v155_v1  ;;  %v23_v8 = vmax.f32 %v21_v6, 0.0  ;;  %v24_v9 = vmax.f32 %v22_v7, 0.0  ;;  %vm69_vm0 = vcmask 1041408   ;;  %s156_s0 = smov [#allocation5]  }
  0x14   :  { %v32_v3 = vshrl.u32 %v31_v0, 7  ;;  %s94_s18 = sshll.u32 %s156_s0, 4  ;;  %s95_s18 = int_to_ptr.vmem [resolvable:$true] %s94_s18 }
  0x15   :  { %v30_v4 = vunpack.c.0.s8 %v29_v2  ;;  %v27_v10 = vcombine.high %v23_v8, %v23_v8  ;;  %v44_v14 = vcombine.high %v24_v9, %v24_v9  ;;  %s128_s19 = scalar_lea.vmem %s95_s18, 32  ;;  %p133_p9 = scmp.lt.s32.totalorder %s95_s18, %s95_s18 }
  0x16   :  { %p129_p8 = scmp.ne.s32.totalorder %s95_s18, %s128_s19  ;;  %p134_p10 = scmp.lt.s32.totalorder %s128_s19, %s128_s19 }
  0x17   :  { %v33_v5 = vsub.s32 %v30_v4, %v32_v3 }
  0x18   :  { %p135_p11 = por %p134_p10, %p133_p9 }
  0x19   :  { %v34_v11 = vrot.slane %v23_v8, %v33_v5  ;;  %v41_v12 = vrot.slane %v27_v10, %v33_v5  ;;  %v51_v15 = vrot.slane %v24_v9, %v33_v5  ;;  %v58_v21 = vrot.slane %v44_v14, %v33_v5 }
  0x1a   :  { %p136_p12 = pnand %p135_p11, %p129_p8 }
  0x1b   :  { %v42_v13 = vcombine.high %v34_v11, %v34_v11  ;;  %v70_v16 = vsel %vm69_vm0, %v34_v11, 0.0  ;;  %v43_v17 = vcombine.high %v41_v12, %v41_v12  ;;  %v73_v19 = vsel %vm69_vm0, %v41_v12, 0.0 }
  0x1c   :  { %v59_v22 = vcombine.high %v51_v15, %v51_v15  ;;  %v77_v25 = vsel %vm69_vm0, %v51_v15, 0.0  ;;  %v60_v27 = vcombine.high %v58_v21, %v58_v21  ;;  %v81_v30 = vsel %vm69_vm0, %v58_v21, 0.0 }
  0x1d   :  { %v71_v18 = vsel %vm69_vm0, %v42_v13, 0.0  ;;  %v75_v23 = vsel %vm69_vm0, %v43_v17, 0.0 }
  0x1e   :  { %v72_v20 = vadd.f32 %v71_v18, %v70_v16  ;;  %v79_v28 = vsel %vm69_vm0, %v59_v22, 0.0  ;;  %v83_v32 = vsel %vm69_vm0, %v60_v27, 0.0 }
  0x20   :  { %v74_v24 = vadd.f32 %v73_v19, %v72_v20 }
  0x22   :  { %v76_v26 = vadd.f32 %v75_v23, %v74_v24 }
  0x24   :  { %v78_v29 = vadd.f32 %v77_v25, %v76_v26 }
  0x26   :  { %v80_v31 = vadd.f32 %v79_v28, %v78_v29 }
  0x28   :  { %v82_v33 = vadd.f32 %v81_v30, %v80_v31 }
  0x2a   :  { %v84_v34 = vadd.f32 %v83_v32, %v82_v33 }
  0x2c   :  { %85 = vadd.xlane.f32.xlu0 %v84_v34 }
  0xb9   :  { %v86_v35 = vpop.xlane.xlu0 %85 }
  0xba   :  { %87 = vst [vmem:[#allocation5] sm:$0x3] %v86_v35 }
  0xbb   :  { %139 = shalt.err (!%p136_p12)
}
  0xbc   :  { %s140_s22 = scalar_lea.hbm %s200_s1, 32 }
  0xbd   :  { %p141_p13 = scmp.ne.s32.totalorder %s200_s1, %s140_s22  ;;  %p144_p0 = scmp.lt.u32.totalorder %s140_s22, %s200_s1 }
  0xbf   :  { %p146_p1 = pnand %p144_p0, %p141_p13 }
  0xc1   :  { %149 = shalt.err (!%p146_p1)
}
  0xc2   :  { %97 = dma.vmem_to_hbm [thread:$0]  %s95_s18, 32, %s200_s1, [#allocation4]  }
  0xc3   :  { %152 = dma.done.wait [#allocation4], 32  }
  0xc4   :  { %153 = vsyncadd [#allocation4], 4294967264 }
  0xc5   :  { %101 = vsyncpa [#allocation3], 1 }
  0xc6   :  { %102 = vsyncpa [#allocation4], 1 }

</bundles_post_ra>
